<compile_context>
chip_gen: v5e
topology: v5e:2x2
jax: 0.10.0
libtpu: 0.0.40
codegen_flags: <defaults>
</compile_context>

<pallas_src>
import functools

import jax
import jax.numpy as jnp
from jax.experimental import pallas as pl
from jax.experimental.pallas import tpu as pltpu

HIDDEN = 256


def _round_up(x, m):
    return (x + m - 1) // m * m


def make_actor_kernel(max_action):
    max_action = float(max_action)

    def actor_kernel(s_ref, w1_ref, b1_ref, w2_ref, b2_ref, w3_ref, b3_ref, o_ref):
        # layer 1: relu(state @ W1 + b1)   (bf16 MXU operands, f32 accumulate)
        x = s_ref[...].astype(jnp.bfloat16)
        h1 = jnp.dot(x, w1_ref[...], preferred_element_type=jnp.float32)
        h1 = jnp.maximum(h1 + b1_ref[...], 0.0)
        # layer 2: relu(h1 @ W2 + b2)
        h2 = jnp.dot(h1.astype(jnp.bfloat16), w2_ref[...],
                     preferred_element_type=jnp.float32)
        h2 = jnp.maximum(h2 + b2_ref[...], 0.0)
        # layer 3: max_action * tanh(h2 @ W3 + b3)  (W3/b3 zero-padded lane-dense)
        h3 = jnp.dot(h2.astype(jnp.bfloat16), w3_ref[...],
                     preferred_element_type=jnp.float32)
        o_ref[...] = (max_action * jnp.tanh(h3 + b3_ref[...])).astype(o_ref.dtype)

    return actor_kernel


@functools.partial(jax.jit, static_argnames=("max_action",))
def actor_forward(state, params, max_action):
    """3-layer MLP forward, batch-tiled with VMEM-resident weights."""
    w1, b1, w2, b2, w3, b3 = params
    B, S = state.shape
    A = w3.shape[1]

    # Batch tile: multiple of 8 sublanes at small B, 128 rows (full MXU) at large B.
    TM = min(128, _round_up(B, 8))
    B_pad = _round_up(B, TM)
    # Lane-dense output: pad action_dim up to a multiple of 128.
    A_pad = _round_up(A, 128)

    state_p = jnp.pad(state, ((0, B_pad - B), (0, 0)))
    w3_p = jnp.pad(w3, ((0, 0), (0, A_pad - A)))
    b3_p = jnp.pad(b3, ((0, 0), (0, A_pad - A)))

    grid = (B_pad // TM,)

    def resident(shape):
        # Constant block index: loaded once, stays resident across grid steps.
        return pl.BlockSpec(shape, lambda i: tuple(0 for _ in shape))

    flops = 2 * B_pad * (S * HIDDEN + HIDDEN * HIDDEN + HIDDEN * A_pad)
    bytes_accessed = (
        state_p.size * 4
        + (w1.size + w2.size + w3_p.size) * 2     # bf16 weights
        + (b1.size + b2.size + b3_p.size) * 4     # f32 biases
        + B_pad * A_pad * 4                       # f32 output
    )
    cost = pl.CostEstimate(
        flops=flops,
        transcendentals=B_pad * A_pad,
        bytes_accessed=bytes_accessed,
    )

    out = pl.pallas_call(
        make_actor_kernel(max_action),
        out_shape=jax.ShapeDtypeStruct((B_pad, A_pad), jnp.float32),
        grid_spec=pltpu.PrefetchScalarGridSpec(
            num_scalar_prefetch=0,
            grid=grid,
            in_specs=[
                pl.BlockSpec((TM, S), lambda i: (i, 0)),   # state: tiled over batch
                resident(w1.shape),
                resident(b1.shape),
                resident(w2.shape),
                resident(b2.shape),
                resident(w3_p.shape),
                resident(b3_p.shape),
            ],
            out_specs=pl.BlockSpec((TM, A_pad), lambda i: (i, 0)),
        ),
        compiler_params=pltpu.CompilerParams(
            dimension_semantics=("parallel",),
            vmem_limit_bytes=32 * 1024 * 1024,
        ),
        cost_estimate=cost,
    )(state_p, w1, b1, w2, b2, w3_p, b3_p)

    return out[:B, :A]


def init_actor_params(key, state_dim, action_dim, hidden=HIDDEN):
    """Deterministic init mimicking nn.Linear's default U(-1/sqrt(fan_in), +1/sqrt(fan_in)).
    Weights stored as (in_features, out_features) in bf16 (MXU operands); biases f32."""
    keys = jax.random.split(key, 6)

    def linear(kw, kb, fan_in, fan_out):
        bound = 1.0 / jnp.sqrt(fan_in)
        w = jax.random.uniform(kw, (fan_in, fan_out), jnp.float32, -bound, bound)
        b = jax.random.uniform(kb, (1, fan_out), jnp.float32, -bound, bound)
        return w.astype(jnp.bfloat16), b

    w1, b1 = linear(keys[0], keys[1], state_dim, hidden)
    w2, b2 = linear(keys[2], keys[3], hidden, hidden)
    w3, b3 = linear(keys[4], keys[5], hidden, action_dim)
    return (w1, b1, w2, b2, w3, b3)


def actor_ref(state, params, max_action):
    """Pure-JAX reference mirroring the kernel's bf16-operand / f32-accumulate math."""
    w1, b1, w2, b2, w3, b3 = params

    def mm(x, w):
        return jnp.dot(x.astype(jnp.bfloat16).astype(jnp.float32),
                       w.astype(jnp.float32))

    a = jnp.maximum(mm(state, w1) + b1, 0.0)
    a = jnp.maximum(mm(a, w2) + b2, 0.0)
    return max_action * jnp.tanh(mm(a, w3) + b3)


if __name__ == "__main__":
    key = jax.random.PRNGKey(0)
    k_state, k_params = jax.random.split(key)

    batch = 4
    state_dim = 16
    action_dim = 8
    max_action = 1.0

    state = jax.random.normal(k_state, (batch, state_dim), jnp.float32)
    params = init_actor_params(k_params, state_dim, action_dim)

    out = actor_forward(state, params, max_action)
    out = jax.block_until_ready(out)

    ref = actor_ref(state, params, max_action)
    assert out.shape == (batch, action_dim)
    assert jnp.allclose(out, ref, atol=1e-3, rtol=1e-3), (
        f"max abs err = {jnp.max(jnp.abs(out - ref))}")

    print("KERNEL_OK")
</pallas_src>

<mosaic_0001>
module attributes {stable_mosaic.version = 11 : i64} {
  func.func @actor_kernel(%arg0: i32, %arg1: memref<8x16xf32, #tpu.memory_space<vmem>>, %arg2: memref<16x256xbf16, #tpu.memory_space<vmem>>, %arg3: memref<1x256xf32, #tpu.memory_space<vmem>>, %arg4: memref<256x256xbf16, #tpu.memory_space<vmem>>, %arg5: memref<1x256xf32, #tpu.memory_space<vmem>>, %arg6: memref<256x128xbf16, #tpu.memory_space<vmem>>, %arg7: memref<1x128xf32, #tpu.memory_space<vmem>>, %arg8: memref<8x128xf32, #tpu.memory_space<vmem>>) attributes {dimension_semantics = [#tpu.dimension_semantics<parallel>], iteration_bounds = array<i64: 1>, scalar_prefetch = 0 : i64, scratch_operands = 0 : i64, tpu.core_type = #tpu.core_type<tc>, window_params = [{transform_indices = @transform_0, window_bounds = array<i64: 8, 16>}, {pipeline_mode = #tpu.pipeline_mode<synchronous>, transform_indices = @transform_1, window_bounds = array<i64: 16, 256>}, {pipeline_mode = #tpu.pipeline_mode<synchronous>, transform_indices = @transform_2, window_bounds = array<i64: 1, 256>}, {pipeline_mode = #tpu.pipeline_mode<synchronous>, transform_indices = @transform_3, window_bounds = array<i64: 256, 256>}, {pipeline_mode = #tpu.pipeline_mode<synchronous>, transform_indices = @transform_4, window_bounds = array<i64: 1, 256>}, {pipeline_mode = #tpu.pipeline_mode<synchronous>, transform_indices = @transform_5, window_bounds = array<i64: 256, 128>}, {pipeline_mode = #tpu.pipeline_mode<synchronous>, transform_indices = @transform_6, window_bounds = array<i64: 1, 128>}, {transform_indices = @transform_7, window_bounds = array<i64: 8, 128>}]} {
    %c0 = arith.constant 0 : index
    %c0_0 = arith.constant 0 : index
    %0 = vector.load %arg1[%c0, %c0_0] : memref<8x16xf32, #tpu.memory_space<vmem>>, vector<8x16xf32>
    %1 = arith.truncf %0 : vector<8x16xf32> to vector<8x16xbf16>
    %c0_1 = arith.constant 0 : index
    %c0_2 = arith.constant 0 : index
    %2 = vector.load %arg2[%c0_1, %c0_2] : memref<16x256xbf16, #tpu.memory_space<vmem>>, vector<16x256xbf16>
    %cst = arith.constant dense<0.000000e+00> : vector<8x256xf32>
    %3 = tpu.matmul %1, %2, %cst {dimension_numbers = #tpu.dot_dimension_numbers<[1], [0], [0], [1], [0, 0, 1, 1], [], []>} : vector<8x16xbf16>, vector<16x256xbf16>, vector<8x256xf32> -> vector<8x256xf32>
    %c0_3 = arith.constant 0 : index
    %c0_4 = arith.constant 0 : index
    %4 = vector.load %arg3[%c0_3, %c0_4] : memref<1x256xf32, #tpu.memory_space<vmem>>, vector<1x256xf32>
    %5 = vector.broadcast %4 : vector<1x256xf32> to vector<8x256xf32>
    %6 = arith.addf %3, %5 : vector<8x256xf32>
    %cst_5 = arith.constant 0.000000e+00 : f32
    %7 = vector.broadcast %cst_5 : f32 to vector<8x256xf32>
    %8 = arith.maximumf %6, %7 : vector<8x256xf32>
    %9 = arith.truncf %8 : vector<8x256xf32> to vector<8x256xbf16>
    %c0_6 = arith.constant 0 : index
    %c0_7 = arith.constant 0 : index
    %10 = vector.load %arg4[%c0_6, %c0_7] : memref<256x256xbf16, #tpu.memory_space<vmem>>, vector<256x256xbf16>
    %cst_8 = arith.constant dense<0.000000e+00> : vector<8x256xf32>
    %11 = tpu.matmul %9, %10, %cst_8 {dimension_numbers = #tpu.dot_dimension_numbers<[1], [0], [0], [1], [0, 0, 1, 1], [], []>} : vector<8x256xbf16>, vector<256x256xbf16>, vector<8x256xf32> -> vector<8x256xf32>
    %c0_9 = arith.constant 0 : index
    %c0_10 = arith.constant 0 : index
    %12 = vector.load %arg5[%c0_9, %c0_10] : memref<1x256xf32, #tpu.memory_space<vmem>>, vector<1x256xf32>
    %13 = vector.broadcast %12 : vector<1x256xf32> to vector<8x256xf32>
    %14 = arith.addf %11, %13 : vector<8x256xf32>
    %cst_11 = arith.constant 0.000000e+00 : f32
    %15 = vector.broadcast %cst_11 : f32 to vector<8x256xf32>
    %16 = arith.maximumf %14, %15 : vector<8x256xf32>
    %17 = arith.truncf %16 : vector<8x256xf32> to vector<8x256xbf16>
    %c0_12 = arith.constant 0 : index
    %c0_13 = arith.constant 0 : index
    %18 = vector.load %arg6[%c0_12, %c0_13] : memref<256x128xbf16, #tpu.memory_space<vmem>>, vector<256x128xbf16>
    %cst_14 = arith.constant dense<0.000000e+00> : vector<8x128xf32>
    %19 = tpu.matmul %17, %18, %cst_14 {dimension_numbers = #tpu.dot_dimension_numbers<[1], [0], [0], [1], [0, 0, 1, 1], [], []>} : vector<8x256xbf16>, vector<256x128xbf16>, vector<8x128xf32> -> vector<8x128xf32>
    %c0_15 = arith.constant 0 : index
    %c0_16 = arith.constant 0 : index
    %20 = vector.load %arg7[%c0_15, %c0_16] : memref<1x128xf32, #tpu.memory_space<vmem>>, vector<1x128xf32>
    %21 = vector.broadcast %20 : vector<1x128xf32> to vector<8x128xf32>
    %22 = arith.addf %19, %21 : vector<8x128xf32>
    %23 = math.tanh %22 : vector<8x128xf32>
    %cst_17 = arith.constant 1.000000e+00 : f32
    %24 = vector.broadcast %cst_17 : f32 to vector<8x128xf32>
    %25 = arith.mulf %24, %23 : vector<8x128xf32>
    %c0_18 = arith.constant 0 : index
    %c0_19 = arith.constant 0 : index
    %26 = vector.load %arg8[%c0_18, %c0_19] : memref<8x128xf32, #tpu.memory_space<vmem>>, vector<8x128xf32>
    tpu.vector_store %arg8[%c0_18, %c0_19], %25 {strides = array<i32>} : memref<8x128xf32, #tpu.memory_space<vmem>>, vector<8x128xf32>,
    return
  }
  func.func @transform_0(%arg0: i32) -> (i32, i32) {
    %c0_i32 = arith.constant 0 : i32
    %c0_i32_0 = arith.constant 0 : i32
    return %arg0, %c0_i32 : i32, i32
  }
  func.func @transform_1(%arg0: i32) -> (i32, i32) {
    %c0_i32 = arith.constant 0 : i32
    %c0_i32_0 = arith.constant 0 : i32
    %c0_i32_1 = arith.constant 0 : i32
    return %c0_i32, %c0_i32_0 : i32, i32
  }
  func.func @transform_2(%arg0: i32) -> (i32, i32) {
    %c0_i32 = arith.constant 0 : i32
    %c0_i32_0 = arith.constant 0 : i32
    %c0_i32_1 = arith.constant 0 : i32
    return %c0_i32, %c0_i32_0 : i32, i32
  }
  func.func @transform_3(%arg0: i32) -> (i32, i32) {
    %c0_i32 = arith.constant 0 : i32
    %c0_i32_0 = arith.constant 0 : i32
    %c0_i32_1 = arith.constant 0 : i32
    return %c0_i32, %c0_i32_0 : i32, i32
  }
  func.func @transform_4(%arg0: i32) -> (i32, i32) {
    %c0_i32 = arith.constant 0 : i32
    %c0_i32_0 = arith.constant 0 : i32
    %c0_i32_1 = arith.constant 0 : i32
    return %c0_i32, %c0_i32_0 : i32, i32
  }
  func.func @transform_5(%arg0: i32) -> (i32, i32) {
    %c0_i32 = arith.constant 0 : i32
    %c0_i32_0 = arith.constant 0 : i32
    %c0_i32_1 = arith.constant 0 : i32
    return %c0_i32, %c0_i32_0 : i32, i32
  }
  func.func @transform_6(%arg0: i32) -> (i32, i32) {
    %c0_i32 = arith.constant 0 : i32
    %c0_i32_0 = arith.constant 0 : i32
    %c0_i32_1 = arith.constant 0 : i32
    return %c0_i32, %c0_i32_0 : i32, i32
  }
  func.func @transform_7(%arg0: i32) -> (i32, i32) {
    %c0_i32 = arith.constant 0 : i32
    %c0_i32_0 = arith.constant 0 : i32
    return %arg0, %c0_i32 : i32, i32
  }
}

</mosaic_0001>

<bundles_post_ra>
// kernel: actor_forward.1
= control target key start
LH: loop header
LB: loop body
LE: loop exit
PB: predicated region body
PF: predicated region fallthrough
CT: control target
= control target key end

     0   :  { %vm47_vm0 = vcmask 130048   ;;  %s1063_s1 = inlined_call_operand.vmem [shape: bf16[16,256], index: 1, kind: input, shape index: {}]   ;;  %s1064_s0 = inlined_call_operand.vmem [shape: f32[8,16], index: 0, kind: input, shape index: {}]   ;;  %s1065_s3 = inlined_call_operand.vmem [shape: bf16[256,256], index: 3, kind: input, shape index: {}]   ;;  %s1066_s5 = inlined_call_operand.vmem [shape: bf16[256,128], index: 5, kind: input, shape index: {}]   ;;  %s1067_s2 = inlined_call_operand.vmem [shape: f32[1,256], index: 2, kind: input, shape index: {}]   ;;  %s1068_s4 = inlined_call_operand.vmem [shape: f32[1,256], index: 4, kind: input, shape index: {}]   ;;  %s1069_s6 = inlined_call_operand.vmem [shape: f32[1,128], index: 6, kind: input, shape index: {}]   ;;  %s1070_s7 = inlined_call_operand.vmem [shape: f32[8,128], index: 7, kind: output, shape index: {}]  }
   0x1   :  { %v501_v0 = vld [vmem:[%s1063_s1] sm:$0xf]  ;;  %v702_v1 = vld [vmem:[%s1063_s1 + $0x4] sm:$0xf0]  ;;  %v701_v2 = vld [vmem:[%s1063_s1 + $0x4] sm:$0xf] }
   0x2   :  { %v502_v3 = vor.u32 %v702_v1, %v501_v0  ;;  %v503_v4 = vld [vmem:[%s1063_s1 + $0x8] sm:$0xf0]  ;;  %v27_v5 = vld [vmem:[%s1064_s0] sm:$0xff]  ;;  %v567_v6 = vld [vmem:[%s1065_s3 + $0x70] sm:$0xf] }
   0x3   :  { %v506_v7 = vor.u32 %v701_v2, %v503_v4  ;;  %v28_v8 = vpack.c.bf16 %v27_v5, %v27_v5  ;;  %v718_v9 = vld [vmem:[%s1065_s3 + $0x74] sm:$0xf0]  ;;  %v631_v10 = vld [vmem:[%s1065_s3 + $0xf0] sm:$0xf]  ;;  %v717_v14 = vld [vmem:[%s1065_s3 + $0x74] sm:$0xf] }
   0x4   :  { %v734_v11 = vld [vmem:[%s1065_s3 + $0xf4] sm:$0xf0]  ;;  %58 = vmatpush.bf16.msra.mxu0 %v502_v3  ;;  %v568_v12 = vor.u32 %v718_v9, %v567_v6  ;;  %v569_v15 = vld [vmem:[%s1065_s3 + $0x78] sm:$0xf0]  ;;  %v733_v16 = vld [vmem:[%s1065_s3 + $0xf4] sm:$0xf] }
   0x5   :  { %v632_v13 = vor.u32 %v734_v11, %v631_v10  ;;  %71 = vmatpush.bf16.msra.mxu1 %v506_v7  ;;  %v572_v17 = vor.u32 %v717_v14, %v569_v15  ;;  %v633_v18 = vld [vmem:[%s1065_s3 + $0xf8] sm:$0xf0]  ;;  %v559_v19 = vld [vmem:[%s1065_s3 + $0x60] sm:$0xf]  ;;  %v716_v20 = vld [vmem:[%s1065_s3 + $0x64] sm:$0xf0] }
   0x6   :  { %279 = vmatpush.bf16.msra.mxu2 %v568_v12  ;;  %v636_v21 = vor.u32 %v733_v16, %v633_v18  ;;  %v560_v22 = vor.u32 %v716_v20, %v559_v19  ;;  %v623_v23 = vld [vmem:[%s1065_s3 + $0xe0] sm:$0xf]  ;;  %v732_v24 = vld [vmem:[%s1065_s3 + $0xe4] sm:$0xf0]  ;;  %v715_v25 = vld [vmem:[%s1065_s3 + $0x64] sm:$0xf] }
   0x7   :  { %292 = vmatpush.bf16.msra.mxu3 %v632_v13  ;;  %507 = vmatmul.msk.bf16.vlgmr.msra.gmra.mxu0 %vm47_vm0, %v28_v8  ;;  %v624_v26 = vor.u32 %v732_v24, %v623_v23  ;;  %v561_v27 = vld [vmem:[%s1065_s3 + $0x68] sm:$0xf0]  ;;  %v731_v28 = vld [vmem:[%s1065_s3 + $0xe4] sm:$0xf]  ;;  %v551_v31 = vld [vmem:[%s1065_s3 + $0x50] sm:$0xf] }
   0x8   :  { %v625_v29 = vld [vmem:[%s1065_s3 + $0xe8] sm:$0xf0]  ;;  %508 = vmatmul.msk.bf16.vlgmr.msra.gmra.mxu1 %vm47_vm0, %v28_v8  ;;  %305 = vmatpush.bf16.msrb.mxu0 %v572_v17  ;;  %v564_v30 = vor.u32 %v715_v25, %v561_v27  ;;  %v714_v32 = vld [vmem:[%s1065_s3 + $0x54] sm:$0xf0]  ;;  %v615_v33 = vld [vmem:[%s1065_s3 + $0xd0] sm:$0xf] }
   0x9   :  { %318 = vmatpush.bf16.msrb.mxu1 %v636_v21  ;;  %v628_v34 = vor.u32 %v731_v28, %v625_v29  ;;  %v730_v35 = vld [vmem:[%s1065_s3 + $0xd4] sm:$0xf0]  ;;  %v713_v36 = vld [vmem:[%s1065_s3 + $0x54] sm:$0xf]  ;;  %v553_v37 = vld [vmem:[%s1065_s3 + $0x58] sm:$0xf0]  ;;  %v552_v38 = vor.u32 %v714_v32, %v551_v31 }
   0xa   :  { %280 = vmatpush.bf16.msra.mxu2 %v560_v22  ;;  %v616_v39 = vor.u32 %v730_v35, %v615_v33  ;;  %v729_v40 = vld [vmem:[%s1065_s3 + $0xd4] sm:$0xf]  ;;  %v617_v41 = vld [vmem:[%s1065_s3 + $0xd8] sm:$0xf0]  ;;  %v543_v42 = vld [vmem:[%s1065_s3 + $0x40] sm:$0xf]  ;;  %v556_v46 = vor.u32 %v713_v36, %v553_v37 }
   0xb   :  { %293 = vmatpush.bf16.msra.mxu3 %v624_v26  ;;  %v712_v43 = vld [vmem:[%s1065_s3 + $0x44] sm:$0xf0]  ;;  %v607_v44 = vld [vmem:[%s1065_s3 + $0xc0] sm:$0xf]  ;;  %v620_v47 = vor.u32 %v729_v40, %v617_v41  ;;  %v711_v48 = vld [vmem:[%s1065_s3 + $0x44] sm:$0xf] }
   0xc   :  { %v728_v45 = vld [vmem:[%s1065_s3 + $0xc4] sm:$0xf0]  ;;  %306 = vmatpush.bf16.msrb.mxu0 %v564_v30  ;;  %v545_v49 = vld [vmem:[%s1065_s3 + $0x48] sm:$0xf0]  ;;  %v544_v50 = vor.u32 %v712_v43, %v543_v42  ;;  %v727_v52 = vld [vmem:[%s1065_s3 + $0xc4] sm:$0xf] }
   0xd   :  { %319 = vmatpush.bf16.msrb.mxu1 %v628_v34  ;;  %v608_v51 = vor.u32 %v728_v45, %v607_v44  ;;  %v609_v53 = vld [vmem:[%s1065_s3 + $0xc8] sm:$0xf0]  ;;  %v535_v54 = vld [vmem:[%s1065_s3 + $0x30] sm:$0xf]  ;;  %v710_v55 = vld [vmem:[%s1065_s3 + $0x34] sm:$0xf0]  ;;  %v548_v58 = vor.u32 %v711_v48, %v545_v49 }
   0xe   :  { %281 = vmatpush.bf16.msra.mxu2 %v552_v38  ;;  %v599_v56 = vld [vmem:[%s1065_s3 + $0xb0] sm:$0xf]  ;;  %v726_v57 = vld [vmem:[%s1065_s3 + $0xb4] sm:$0xf0]  ;;  %v612_v59 = vor.u32 %v727_v52, %v609_v53  ;;  %v709_v60 = vld [vmem:[%s1065_s3 + $0x34] sm:$0xf]  ;;  %v536_v62 = vor.u32 %v710_v55, %v535_v54 }
   0xf   :  { %294 = vmatpush.bf16.msra.mxu3 %v616_v39  ;;  %v537_v61 = vld [vmem:[%s1065_s3 + $0x38] sm:$0xf0]  ;;  %v600_v63 = vor.u32 %v726_v57, %v599_v56  ;;  %v725_v0 = vld [vmem:[%s1065_s3 + $0xb4] sm:$0xf]  ;;  %v527_v2 = vld [vmem:[%s1065_s3 + $0x20] sm:$0xf] }
  0x10   :  { %307 = vmatpush.bf16.msrb.mxu0 %v556_v46  ;;  %v601_v1 = vld [vmem:[%s1065_s3 + $0xb8] sm:$0xf0]  ;;  %v708_v3 = vld [vmem:[%s1065_s3 + $0x24] sm:$0xf0]  ;;  %v591_v4 = vld [vmem:[%s1065_s3 + $0xa0] sm:$0xf]  ;;  %v540_v6 = vor.u32 %v709_v60, %v537_v61 }
  0x11   :  { %320 = vmatpush.bf16.msrb.mxu1 %v620_v47  ;;  %v724_v5 = vld [vmem:[%s1065_s3 + $0xa4] sm:$0xf0]  ;;  %v604_v7 = vor.u32 %v725_v0, %v601_v1  ;;  %v707_v8 = vld [vmem:[%s1065_s3 + $0x24] sm:$0xf]  ;;  %v529_v9 = vld [vmem:[%s1065_s3 + $0x28] sm:$0xf0]  ;;  %v528_v10 = vor.u32 %v708_v3, %v527_v2 }
  0x12   :  { %282 = vmatpush.bf16.msra.mxu2 %v544_v50  ;;  %v592_v11 = vor.u32 %v724_v5, %v591_v4  ;;  %v723_v12 = vld [vmem:[%s1065_s3 + $0xa4] sm:$0xf]  ;;  %v593_v13 = vld [vmem:[%s1065_s3 + $0xa8] sm:$0xf0]  ;;  %v532_v14 = vor.u32 %v707_v8, %v529_v9  ;;  %v519_v16 = vld [vmem:[%s1065_s3 + $0x10] sm:$0xf] }
  0x13   :  { %295 = vmatpush.bf16.msra.mxu3 %v608_v51  ;;  %v596_v15 = vor.u32 %v723_v12, %v593_v13  ;;  %v706_v17 = vld [vmem:[%s1065_s3 + $0x14] sm:$0xf0]  ;;  %v583_v18 = vld [vmem:[%s1065_s3 + $0x90] sm:$0xf]  ;;  %v705_v21 = vld [vmem:[%s1065_s3 + $0x14] sm:$0xf] }
  0x14   :  { %308 = vmatpush.bf16.msrb.mxu0 %v548_v58  ;;  %v520_v19 = vor.u32 %v706_v17, %v519_v16  ;;  %v722_v20 = vld [vmem:[%s1065_s3 + $0x94] sm:$0xf0]  ;;  %v521_v22 = vld [vmem:[%s1065_s3 + $0x18] sm:$0xf0]  ;;  %v721_v25 = vld [vmem:[%s1065_s3 + $0x94] sm:$0xf] }
  0x15   :  { %321 = vmatpush.bf16.msrb.mxu1 %v612_v59  ;;  %v584_v23 = vor.u32 %v722_v20, %v583_v18  ;;  %v524_v24 = vor.u32 %v705_v21, %v521_v22  ;;  %v585_v26 = vld [vmem:[%s1065_s3 + $0x98] sm:$0xf0]  ;;  %v511_v28 = vld [vmem:[%s1065_s3] sm:$0xf]  ;;  %v704_v29 = vld [vmem:[%s1065_s3 + $0x4] sm:$0xf0] }
  0x16   :  { %283 = vmatpush.bf16.msra.mxu2 %v536_v62  ;;  %v588_v27 = vor.u32 %v721_v25, %v585_v26  ;;  %v575_v30 = vld [vmem:[%s1065_s3 + $0x80] sm:$0xf]  ;;  %v512_v31 = vor.u32 %v704_v29, %v511_v28  ;;  %v720_v32 = vld [vmem:[%s1065_s3 + $0x84] sm:$0xf0]  ;;  %v703_v33 = vld [vmem:[%s1065_s3 + $0x4] sm:$0xf] }
  0x17   :  { %296 = vmatpush.bf16.msra.mxu3 %v600_v63  ;;  %v513_v34 = vld [vmem:[%s1065_s3 + $0x8] sm:$0xf0]  ;;  %v576_v35 = vor.u32 %v720_v32, %v575_v30  ;;  %v719_v37 = vld [vmem:[%s1065_s3 + $0x84] sm:$0xf]  ;;  %v750_v40 = vld [vmem:[%s1066_s5 + $0x78] sm:$0xff] }
  0x18   :  { %309 = vmatpush.bf16.msrb.mxu0 %v540_v6  ;;  %v516_v36 = vor.u32 %v703_v33, %v513_v34  ;;  %v577_v38 = vld [vmem:[%s1065_s3 + $0x88] sm:$0xf0]  ;;  %v742_v41 = vld [vmem:[%s1066_s5 + $0x38] sm:$0xff]  ;;  %v749_v42 = vld [vmem:[%s1066_s5 + $0x70] sm:$0xff] }
  0x19   :  { %322 = vmatpush.bf16.msrb.mxu1 %v604_v7  ;;  %v580_v39 = vor.u32 %v719_v37, %v577_v38  ;;  %v741_v43 = vld [vmem:[%s1066_s5 + $0x30] sm:$0xff]  ;;  %v748_v44 = vld [vmem:[%s1066_s5 + $0x68] sm:$0xff]  ;;  %v747_v46 = vld [vmem:[%s1066_s5 + $0x60] sm:$0xff] }
  0x1a   :  { %284 = vmatpush.bf16.msra.mxu2 %v528_v10  ;;  %v740_v45 = vld [vmem:[%s1066_s5 + $0x28] sm:$0xff]  ;;  %v739_v47 = vld [vmem:[%s1066_s5 + $0x20] sm:$0xff]  ;;  %v746_v48 = vld [vmem:[%s1066_s5 + $0x58] sm:$0xff] }
  0x1b   :  { %297 = vmatpush.bf16.msra.mxu3 %v592_v11  ;;  %v31_v49 = vld [vmem:[%s1067_s2] sm:$0x3]  ;;  %v745_v50 = vld [vmem:[%s1066_s5 + $0x50] sm:$0xff]  ;;  %v738_v63 = vld [vmem:[%s1066_s5 + $0x18] sm:$0xff] }
  0x1c   :  { %310 = vmatpush.bf16.msrb.mxu0 %v532_v14  ;;  %v33_v51 = vperm.slane %v31_v49, 0  ;;  %v34_v52 = vperm.slane %v31_v49, 1  ;;  %v744_v0 = vld [vmem:[%s1066_s5 + $0x48] sm:$0xff]  ;;  %v737_v1 = vld [vmem:[%s1066_s5 + $0x10] sm:$0xff]  ;;  %v743_v2 = vld [vmem:[%s1066_s5 + $0x40] sm:$0xff] }
  0x1d   :  { %323 = vmatpush.bf16.msrb.mxu1 %v596_v15  ;;  %v736_v3 = vld [vmem:[%s1066_s5 + $0x8] sm:$0xff]  ;;  %v735_v4 = vld [vmem:[%s1066_s5] sm:$0xff] }
  0x1e   :  { %285 = vmatpush.bf16.msra.mxu2 %v520_v19  ;;  %v113_v5 = vld [vmem:[%s1068_s4] sm:$0x3] }
  0x1f   :  { %298 = vmatpush.bf16.msra.mxu3 %v584_v23  ;;  %v116_v6 = vperm.slane %v113_v5, 1  ;;  %v115_v11 = vperm.slane %v113_v5, 0  ;;  %v751_v25 = vld [vmem:[%s1069_s6] ss:$0 sm:$0xff] }
  0x20   :  { %311 = vmatpush.bf16.msrb.mxu0 %v524_v24 }
  0x21   :  { %324 = vmatpush.bf16.msrb.mxu1 %v588_v27 }
  0x22   :  { %286 = vmatpush.bf16.msra.mxu2 %v512_v31 }
  0x23   :  { %299 = vmatpush.bf16.msra.mxu3 %v576_v35 }
  0x24   :  { %312 = vmatpush.bf16.msrb.mxu0 %v516_v36 }
  0x25   :  { %325 = vmatpush.bf16.msrb.mxu1 %v580_v39 }
  0x26   :  { %467 = vmatpush.bf16.msrb.mxu2 %v742_v41 }
  0x27   :  { %480 = vmatpush.bf16.msrb.mxu3 %v750_v40 }
  0x2a   :  { %468 = vmatpush.bf16.msrb.mxu2 %v741_v43 }
  0x2b   :  { %481 = vmatpush.bf16.msrb.mxu3 %v749_v42 }
  0x2e   :  { %469 = vmatpush.bf16.msrb.mxu2 %v740_v45 }
  0x2f   :  { %482 = vmatpush.bf16.msrb.mxu3 %v748_v44 }
  0x32   :  { %470 = vmatpush.bf16.msrb.mxu2 %v739_v47 }
  0x33   :  { %483 = vmatpush.bf16.msrb.mxu3 %v747_v46 }
  0x36   :  { %471 = vmatpush.bf16.msrb.mxu2 %v738_v63 }
  0x37   :  { %484 = vmatpush.bf16.msrb.mxu3 %v746_v48 }
  0x3a   :  { %472 = vmatpush.bf16.msrb.mxu2 %v737_v1 }
  0x3b   :  { %485 = vmatpush.bf16.msrb.mxu3 %v745_v50 }
  0x3e   :  { %473 = vmatpush.bf16.msrb.mxu2 %v736_v3 }
  0x3f   :  { %486 = vmatpush.bf16.msrb.mxu3 %v744_v0 }
  0x42   :  { %474 = vmatpush.bf16.msrb.mxu2 %v735_v4 }
  0x43   :  { %487 = vmatpush.bf16.msrb.mxu3 %v743_v2 }
  0x84   :  { %v60_v53 = vpop.f32.mrf.mxu0 }
  0x85   :  { %v61_v54 = vadd.f32 %v60_v53, %v33_v51  ;;  %v73_v55 = vpop.f32.mrf.mxu1 }
  0x86   :  { %v74_v56 = vadd.f32 %v73_v55, %v34_v52 }
  0x87   :  { %v77_v57 = vmax.f32 %v61_v54, 0.0 }
  0x88   :  { %v78_v58 = vmax.f32 %v74_v56, 0.0 }
  0x89   :  { %v79_v59 = vpack.c.bf16 %v77_v57, %v77_v57 }
  0x8a   :  { %v80_v60 = vpack.c.bf16 %v78_v58, %v78_v58 }
  0x8b   :  { %287 = vmatmul.bf16.vlgmr.msra.gmra.mxu2 %v79_v59  ;;  %313 = vmatmul.bf16.vlgmr.msrb.gmra.mxu0 %v79_v59 }
  0x8c   :  { %300 = vmatmul.bf16.vlgmr.msra.gmra.mxu3 %v80_v60  ;;  %326 = vmatmul.bf16.vlgmr.msrb.gmra.mxu1 %v80_v60  ;;  %v62_v61 = vpop.f32.mrf.mxu0 }
  0x8d   :  { %v75_v62 = vpop.f32.mrf.mxu1 }
 0x108   :  { %v314_v7 = vpop.f32.mrf.mxu0 }
 0x109   :  { %v315_v8 = vadd.f32 %v314_v7, %v116_v6  ;;  %v327_v9 = vpop.f32.mrf.mxu1 }
 0x10b   :  { %v328_v10 = vadd.f32 %v327_v9, %v315_v8 }
 0x10d   :  { %v332_v12 = vmax.f32 %v328_v10, 0.0 }
 0x10e   :  { %v288_v13 = vpop.f32.mrf.mxu2 }
 0x10f   :  { %v334_v14 = vpack.c.bf16 %v332_v12, %v332_v12  ;;  %v289_v15 = vadd.f32 %v288_v13, %v115_v11  ;;  %v301_v16 = vpop.f32.mrf.mxu3 }
 0x110   :  { %v316_v17 = vpop.f32.mrf.mxu0 }
 0x111   :  { %v302_v18 = vadd.f32 %v301_v16, %v289_v15  ;;  %v329_v19 = vpop.f32.mrf.mxu1  ;;  %488 = vmatmul.bf16.vlgmr.msrb.gmra.mxu3 %v334_v14 }
 0x113   :  { %v331_v20 = vmax.f32 %v302_v18, 0.0 }
 0x115   :  { %v333_v21 = vpack.c.bf16 %v331_v20, %v331_v20 }
 0x116   :  { %v290_v22 = vpop.f32.mrf.mxu2 }
 0x117   :  { %v303_v23 = vpop.f32.mrf.mxu3  ;;  %475 = vmatmul.bf16.vlgmr.msrb.gmra.mxu2 %v333_v21 }
 0x194   :  { %v489_v24 = vpop.f32.mrf.mxu3 }
 0x19a   :  { %v476_v26 = vpop.f32.mrf.mxu2 }
 0x19b   :  { %v477_v27 = vadd.f32 %v751_v25, %v476_v26 }
 0x19c   :  { %v491_v28 = vpop.f32.mrf.mxu3 }
 0x19d   :  { %v490_v29 = vadd.f32 %v489_v24, %v477_v27 }
 0x19f   :  { %752 = vtanh.f32 %v490_v29 }
 0x1a2   :  { %v478_v30 = vpop.f32.mrf.mxu2 }
 0x1a5   :  { %v753_v31 = vpop.eup %752 }
 0x1a6   :  { %494 = vst [vmem:[%s1070_s7] sm:$0xff] %v753_v31 }

</bundles_post_ra>
